<compile_context>
chip_gen: v5e
topology: v5e:2x2
jax: 0.10.0
libtpu: 0.0.40
codegen_flags: <defaults>
</compile_context>

<pallas_src>
import functools

import numpy as np
import jax
import jax.numpy as jnp
from jax.experimental import pallas as pl
from jax.experimental.pallas import tpu as pltpu

LRELU_SLOPE = 0.2
_LANE = 128


def _round_up(x, m):
    return ((x + m - 1) // m) * m


# ---------------------------------------------------------------------------
# Pallas kernels
# ---------------------------------------------------------------------------
def _spec_mag_kernel(frames_ref, basis_ref, out_ref, *, nb_pad):
    """|STFT| magnitude: one wide MXU matmul against the fused (cos|sin) basis,
    then sqrt(re^2 + im^2) in f32 on the VPU/EUP."""
    prod = jnp.dot(frames_ref[...], basis_ref[...],
                   preferred_element_type=jnp.float32)          # (tm, 2*NB) f32
    re = prod[:, :nb_pad]
    im = prod[:, nb_pad:]
    out_ref[...] = jnp.sqrt(re * re + im * im)


def _conv_mm_kernel(p_ref, w_ref, b_ref, out_ref, *, leaky):
    """im2col conv tile as bf16 MXU matmul + f32 bias (+ LeakyReLU) epilogue."""
    acc = jnp.dot(p_ref[...], w_ref[...], preferred_element_type=jnp.float32)
    acc = acc + b_ref[...]
    if leaky:
        acc = jnp.where(acc > 0, acc, LRELU_SLOPE * acc)
    out_ref[...] = acc


def _pick_tile_m(m, max_tile=512):
    return min(max_tile, _round_up(m, 8))


_COMPILER_PARAMS = pltpu.CompilerParams(
    dimension_semantics=("parallel",),
    vmem_limit_bytes=64 * 1024 * 1024,
)


# ---------------------------------------------------------------------------
# Spectrogram (torchaudio.functional.spectrogram, power=1, normalized=False,
# center=True, pad_mode='reflect', onesided=True), DFT in Pallas.
# Returns NHWC: (B, n_frames, n_bins, 1)  [H = time, W = freq, C = 1].
# ---------------------------------------------------------------------------
def spectrogram_pallas(x_bt, n_fft, hop, win_length):
    B, _ = x_bt.shape
    pad = win_length // 2
    xp = jnp.pad(x_bt, ((0, 0), (pad, pad)))                                 # user pad (zeros)
    xp = jnp.pad(xp, ((0, 0), (n_fft // 2, n_fft // 2)), mode="reflect")     # center pad
    L = xp.shape[1]
    n_frames = 1 + (L - n_fft) // hop
    n_bins = n_fft // 2 + 1
    NB = _round_up(n_bins, _LANE)

    # frame extraction (XLA gather glue)
    # TODO(synk): move framing into the kernel (manual DMA over overlapping windows).
    idx = np.arange(n_frames)[:, None] * hop + np.arange(n_fft)[None, :]
    frames = xp[:, idx].reshape(B * n_frames, n_fft)

    # periodic Hann window, zero-padded (centered) to n_fft — folded into the
    # DFT basis; cos and sin halves concatenated and lane-padded to 2*NB.
    n = np.arange(win_length)
    w = 0.5 * (1.0 - np.cos(2.0 * np.pi * n / win_length))
    lpad = (n_fft - win_length) // 2
    w_full = np.pad(w, (lpad, n_fft - win_length - lpad))
    k = np.arange(n_bins)
    nn_ = np.arange(n_fft)
    ang = 2.0 * np.pi * nn_[:, None] * k[None, :] / n_fft
    basis_np = np.zeros((n_fft, 2 * NB), np.float32)
    basis_np[:, :n_bins] = w_full[:, None] * np.cos(ang)
    basis_np[:, NB:NB + n_bins] = w_full[:, None] * np.sin(ang)
    basis = jnp.asarray(basis_np, dtype=jnp.bfloat16)

    M = B * n_frames
    tile_m = _pick_tile_m(M)
    M_pad = _round_up(M, tile_m)
    frames = jnp.pad(frames, ((0, M_pad - M), (0, 0))).astype(jnp.bfloat16)

    mag = pl.pallas_call(
        functools.partial(_spec_mag_kernel, nb_pad=NB),
        out_shape=jax.ShapeDtypeStruct((M_pad, NB), jnp.float32),
        grid=(M_pad // tile_m,),
        in_specs=[
            pl.BlockSpec((tile_m, n_fft), lambda i: (i, 0)),
            pl.BlockSpec((n_fft, 2 * NB), lambda i: (0, 0)),
        ],
        out_specs=pl.BlockSpec((tile_m, NB), lambda i: (i, 0)),
        compiler_params=_COMPILER_PARAMS,
        cost_estimate=pl.CostEstimate(
            flops=2 * M_pad * n_fft * 2 * NB,
            transcendentals=M_pad * NB,
            bytes_accessed=frames.size * 2 + basis.size * 2 + M_pad * NB * 4,
        ),
    )(frames, basis)

    # torch: spectrogram (B,1,freq,time) -> transpose(-1,-2) -> (B,1,time,freq)
    # NHWC equivalent: (B, time, freq, 1)
    return mag[:M, :n_bins].reshape(B, n_frames, n_bins, 1)


# ---------------------------------------------------------------------------
# NonCausalConv2d (padding ((kh-1)//2, (kw-1)//2)) on NHWC activations via
# im2col (NHWC order) + lane-dense tiled Pallas matmul.
# ---------------------------------------------------------------------------
def conv2d_nhwc_pallas(x_nhwc, w, b, stride, leaky):
    """x_nhwc: (B, H, W, C_in). w: (C_out, C_in, kh, kw) PyTorch layout."""
    B, H, W, C = x_nhwc.shape
    C_out, C_in, kh, kw = w.shape
    assert C == C_in
    sh, sw = stride
    ph, pw = (kh - 1) // 2, (kw - 1) // 2
    xp = jnp.pad(x_nhwc, ((0, 0), (ph, ph), (pw, pw), (0, 0)))
    Ho = (H + 2 * ph - kh) // sh + 1
    Wo = (W + 2 * pw - kw) // sw + 1

    # im2col in (kh, kw, C_in) order, NHWC — no NCHW transposes.
    # TODO(synk): fuse the patch extraction into the kernel to remove the
    #             kh*kw HBM inflation of the activations.
    cols = []
    for i in range(kh):
        for j in range(kw):
            cols.append(xp[:, i:i + Ho * sh:sh, j:j + Wo * sw:sw, :])   # (B,Ho,Wo,C)
    K = kh * kw * C
    patches = jnp.stack(cols, axis=3).reshape(B * Ho * Wo, K)

    M = B * Ho * Wo
    N_pad = _round_up(C_out, _LANE)
    tile_m = _pick_tile_m(M)
    M_pad = _round_up(M, tile_m)
    patches = jnp.pad(patches, ((0, M_pad - M), (0, 0))).astype(jnp.bfloat16)

    # weights: (C_out, C_in, kh, kw) -> (kh, kw, C_in, C_out) -> (K, C_out),
    # zero-padded to (K, 128) for lane-dense output; bias likewise.
    w2 = jnp.transpose(w, (2, 3, 1, 0)).reshape(K, C_out)
    w2 = jnp.pad(w2, ((0, 0), (0, N_pad - C_out))).astype(jnp.bfloat16)
    b2 = jnp.pad(b.reshape(1, C_out), ((0, 0), (0, N_pad - C_out))).astype(jnp.float32)

    out = pl.pallas_call(
        functools.partial(_conv_mm_kernel, leaky=leaky),
        out_shape=jax.ShapeDtypeStruct((M_pad, N_pad), jnp.float32),
        grid=(M_pad // tile_m,),
        in_specs=[
            pl.BlockSpec((tile_m, K), lambda i: (i, 0)),
            pl.BlockSpec((K, N_pad), lambda i: (0, 0)),
            pl.BlockSpec((1, N_pad), lambda i: (0, 0)),
        ],
        out_specs=pl.BlockSpec((tile_m, N_pad), lambda i: (i, 0)),
        compiler_params=_COMPILER_PARAMS,
        cost_estimate=pl.CostEstimate(
            flops=2 * M_pad * K * N_pad,
            transcendentals=0,
            bytes_accessed=patches.size * 2 + w2.size * 2 + b2.size * 4
            + M_pad * N_pad * 4,
        ),
    )(patches, w2, b2)

    return out[:M, :C_out].reshape(B, Ho, Wo, C_out)        # NHWC


# ---------------------------------------------------------------------------
# Module: parameter construction + forward
# ---------------------------------------------------------------------------
_KERNEL_SIZES = [(3, 9), (3, 9), (3, 9), (3, 9), (3, 3), (3, 3)]
_STRIDES = [(1, 1), (1, 2), (1, 2), (1, 2), (1, 1), (1, 1)]


def init_spectral_disc_params(key, channels=32):
    in_ch = [1] + [channels] * 5
    out_ch = [channels] * 5 + [1]
    params = []
    for i, (ks, st) in enumerate(zip(_KERNEL_SIZES, _STRIDES)):
        key, kw_, kb_ = jax.random.split(key, 3)
        fan_in = in_ch[i] * ks[0] * ks[1]
        w = jax.random.normal(kw_, (out_ch[i], in_ch[i], ks[0], ks[1]), jnp.float32)
        w = w * (1.0 / np.sqrt(fan_in))
        b = jax.random.normal(kb_, (out_ch[i],), jnp.float32) * 0.01
        params.append({"w": w, "b": b, "stride": st})
    return params, key


def spectral_disc_forward(params, x_b1t, fft_size, hop_size, win_length):
    """x_b1t: (B, 1, T). Returns list of 6 layer outputs in NCHW (module semantics)."""
    h = spectrogram_pallas(x_b1t[:, 0, :], fft_size, hop_size, win_length)  # NHWC
    outs = []
    n_layers = len(params)
    for i, p in enumerate(params):
        h = conv2d_nhwc_pallas(h, p["w"], p["b"], p["stride"], leaky=(i < n_layers - 1))
        outs.append(jnp.transpose(h, (0, 3, 1, 2)))   # NCHW only for the returned copy
    return outs


def multi_res_spectral_disc_forward(all_params, x_b1t, fft_sizes, hop_sizes, win_lengths):
    outs = []
    for params, nfft, hop, win in zip(all_params, fft_sizes, hop_sizes, win_lengths):
        outs.append(spectral_disc_forward(params, x_b1t, nfft, hop, win))
    return outs


# ---------------------------------------------------------------------------
if __name__ == "__main__":
    # Small shapes consistent with the module: (B, 1, T) raw waveform input,
    # three scaled-down STFT resolutions, 6 conv layers, channels=32.
    B, T = 2, 256
    fft_sizes = [64, 128, 32]
    hop_sizes = [16, 32, 8]
    win_lengths = [40, 80, 20]
    channels = 32

    key = jax.random.PRNGKey(0)
    key, kx = jax.random.split(key)
    x = jax.random.normal(kx, (B, 1, T), jnp.float32)

    all_params = []
    for _ in range(len(fft_sizes)):
        params, key = init_spectral_disc_params(key, channels=channels)
        all_params.append(params)

    outs = multi_res_spectral_disc_forward(all_params, x, fft_sizes, hop_sizes, win_lengths)

    for disc_outs in outs:
        for o in disc_outs:
            jax.block_until_ready(o)

    print("KERNEL_OK")
</pallas_src>

<mosaic_0001>
module attributes {stable_mosaic.version = 11 : i64} {
  func.func @_spec_mag_kernel(%arg0: i32, %arg1: memref<40x64xbf16, #tpu.memory_space<vmem>>, %arg2: memref<64x256xbf16, #tpu.memory_space<vmem>>, %arg3: memref<40x128xf32, #tpu.memory_space<vmem>>) attributes {dimension_semantics = [#tpu.dimension_semantics<parallel>], iteration_bounds = array<i64: 1>, scalar_prefetch = 0 : i64, scratch_operands = 0 : i64, tpu.core_type = #tpu.core_type<tc>, window_params = [{transform_indices = @transform_0, window_bounds = array<i64: 40, 64>}, {pipeline_mode = #tpu.pipeline_mode<synchronous>, transform_indices = @transform_1, window_bounds = array<i64: 64, 256>}, {transform_indices = @transform_2, window_bounds = array<i64: 40, 128>}]} {
    %c0 = arith.constant 0 : index
    %c0_0 = arith.constant 0 : index
    %0 = vector.load %arg1[%c0, %c0_0] : memref<40x64xbf16, #tpu.memory_space<vmem>>, vector<40x64xbf16>
    %c0_1 = arith.constant 0 : index
    %c0_2 = arith.constant 0 : index
    %1 = vector.load %arg2[%c0_1, %c0_2] : memref<64x256xbf16, #tpu.memory_space<vmem>>, vector<64x256xbf16>
    %cst = arith.constant dense<0.000000e+00> : vector<40x256xf32>
    %2 = tpu.matmul %0, %1, %cst {dimension_numbers = #tpu.dot_dimension_numbers<[1], [0], [0], [1], [0, 0, 1, 1], [], []>} : vector<40x64xbf16>, vector<64x256xbf16>, vector<40x256xf32> -> vector<40x256xf32>
    %3 = vector.extract_strided_slice %2 {offsets = [0, 0], sizes = [40, 128], strides = [1, 1]} : vector<40x256xf32> to vector<40x128xf32>
    %4 = vector.extract_strided_slice %2 {offsets = [0, 128], sizes = [40, 128], strides = [1, 1]} : vector<40x256xf32> to vector<40x128xf32>
    %5 = arith.mulf %3, %3 : vector<40x128xf32>
    %6 = arith.mulf %4, %4 : vector<40x128xf32>
    %7 = arith.addf %5, %6 : vector<40x128xf32>
    %8 = math.sqrt %7 : vector<40x128xf32>
    %c0_3 = arith.constant 0 : index
    %c0_4 = arith.constant 0 : index
    %9 = vector.load %arg3[%c0_3, %c0_4] : memref<40x128xf32, #tpu.memory_space<vmem>>, vector<40x128xf32>
    tpu.vector_store %arg3[%c0_3, %c0_4], %8 {strides = array<i32>} : memref<40x128xf32, #tpu.memory_space<vmem>>, vector<40x128xf32>,
    return
  }
  func.func @transform_0(%arg0: i32) -> (i32, i32) {
    %c0_i32 = arith.constant 0 : i32
    %c0_i32_0 = arith.constant 0 : i32
    return %arg0, %c0_i32 : i32, i32
  }
  func.func @transform_1(%arg0: i32) -> (i32, i32) {
    %c0_i32 = arith.constant 0 : i32
    %c0_i32_0 = arith.constant 0 : i32
    %c0_i32_1 = arith.constant 0 : i32
    return %c0_i32, %c0_i32_0 : i32, i32
  }
  func.func @transform_2(%arg0: i32) -> (i32, i32) {
    %c0_i32 = arith.constant 0 : i32
    %c0_i32_0 = arith.constant 0 : i32
    return %arg0, %c0_i32 : i32, i32
  }
}

</mosaic_0001>

<bundles_post_ra>
// kernel: tpu_custom_call.1
= control target key start
LH: loop header
LB: loop body
LE: loop exit
PB: predicated region body
PF: predicated region fallthrough
CT: control target
= control target key end

     0   :  { %7 = vsyncpa [#allocation3], 0  ;;  %s463_s0 = inlined_call_operand.hbm [shape: bf16[40,64], index: 0, kind: input, shape index: {}]   ;;  %s464_s1 = inlined_call_operand.hbm [shape: bf16[64,256], index: 1, kind: input, shape index: {}]   ;;  %s465_s2 = inlined_call_operand.hbm [shape: f32[40,128], index: 2, kind: output, shape index: {}]  }
   0x1   :  { %8 = vsyncpa [#allocation6], 0 }
   0x2   :  { %9 = vsyncpa [#allocation4], 0  ;;  %s14_s11 = sshll.u32 %s463_s0, 4  ;;  %s426_s12 = smov [#allocation2]   ;;  %s15_s11 = int_to_ptr.hbm [resolvable:$true] %s14_s11 }
   0x3   :  { %s16_s13 = sshll.u32 %s426_s12, 4  ;;  %s27_s16 = sshll.u32 %s464_s1, 4  ;;  %s17_s13 = int_to_ptr.vmem [resolvable:$true] %s16_s13  ;;  %s28_s16 = int_to_ptr.hbm [resolvable:$true] %s27_s16 }
   0x4   :  { %s427_s17 = smov 64   ;;  %s428_s18 = smov 4  }
   0x5   :  { %22 = dma.hbm_to_vmem [thread:$0]  %s15_s11, 320, %s17_s13, [#allocation3], %s427_s17, %s427_s17, %s428_s18  }
   0x6   :  { %s429_s19 = smov [#allocation5]   ;;  %s430_s21 = smov 128  }
   0x7   :  { %s29_s20 = sshll.u32 %s429_s19, 4  ;;  %s431_s22 = smov 8   ;;  %s30_s20 = int_to_ptr.vmem [resolvable:$true] %s29_s20 }
   0x8   :  { %35 = dma.hbm_to_vmem [thread:$0]  %s28_s16, 1024, %s30_s20, [#allocation6], %s430_s21, %s430_s21, %s431_s22  }
   0x9   :  { %420 = dma.done.wait [#allocation3], 320  }
   0xa   :  { %421 = vsyncadd [#allocation3], 4294966976 }
   0xb   :  { %422 = dma.done.wait [#allocation6], 1024  }
   0xc   :  { %423 = vsyncadd [#allocation6], 4294966272  ;;  %v301_v0 = vld [vmem:[#allocation5 + $0x30] sm:$0xf]  ;;  %v322_v1 = vld [vmem:[#allocation5 + $0x34] sm:$0xf0] }
   0xd   :  { %v321_v2 = vld [vmem:[#allocation5 + $0x34] sm:$0xf]  ;;  %v302_v3 = vor.u32 %v322_v1, %v301_v0  ;;  %v303_v4 = vld [vmem:[#allocation5 + $0x38] sm:$0xf0]  ;;  %v293_v5 = vld [vmem:[#allocation5 + $0x20] sm:$0xf] }
   0xe   :  { %v320_v6 = vld [vmem:[#allocation5 + $0x24] sm:$0xf0]  ;;  %v306_v7 = vor.u32 %v321_v2, %v303_v4  ;;  %v319_v8 = vld [vmem:[#allocation5 + $0x24] sm:$0xf]  ;;  %v295_v9 = vld [vmem:[#allocation5 + $0x28] sm:$0xf0] }
   0xf   :  { %125 = vmatpush.bf16.msra.mxu0 %v302_v3  ;;  %323 = vmatpush.bf16.msra.mxu2 %v302_v3  ;;  %v294_v10 = vor.u32 %v320_v6, %v293_v5  ;;  %v298_v11 = vor.u32 %v319_v8, %v295_v9  ;;  %v285_v12 = vld [vmem:[#allocation5 + $0x10] sm:$0xf]  ;;  %v318_v13 = vld [vmem:[#allocation5 + $0x14] sm:$0xf0]  ;;  %v317_v14 = vld [vmem:[#allocation5 + $0x14] sm:$0xf] }
  0x10   :  { %148 = vmatpush.bf16.msra.mxu1 %v306_v7  ;;  %327 = vmatpush.bf16.msra.mxu3 %v306_v7  ;;  %v287_v15 = vld [vmem:[#allocation5 + $0x18] sm:$0xf0]  ;;  %v286_v16 = vor.u32 %v318_v13, %v285_v12  ;;  %v277_v18 = vld [vmem:[#allocation5] sm:$0xf]  ;;  %v316_v19 = vld [vmem:[#allocation5 + $0x4] sm:$0xf0] }
  0x11   :  { %v290_v17 = vor.u32 %v317_v14, %v287_v15  ;;  %v315_v20 = vld [vmem:[#allocation5 + $0x4] sm:$0xf]  ;;  %v279_v21 = vld [vmem:[#allocation5 + $0x8] sm:$0xf0]  ;;  %v278_v22 = vor.u32 %v316_v19, %v277_v18  ;;  %v314_v25 = vld [vmem:[#allocation2 + $0x8] sm:$0xff]  ;;  %vm111_vm0 = vcmask 523264  }
  0x12   :  { %v282_v23 = vor.u32 %v315_v20, %v279_v21  ;;  %v313_v24 = vld [vmem:[#allocation2] sm:$0xff]  ;;  %v49_v26 = vld [vmem:[#allocation2 + $0x10] sm:$0xf]  ;;  %s432_s0 = smov [#allocation7]   ;;  %s253_s25 = sshll.u32 %s465_s2, 4  ;;  %s254_s25 = int_to_ptr.hbm [resolvable:$true] %s253_s25 }
  0x13   :  { %126 = vmatpush.bf16.msra.mxu0 %v294_v10  ;;  %324 = vmatpush.bf16.msra.mxu2 %v294_v10  ;;  %v67_v27 = vunpack.c.l.b16 %v49_v26  ;;  %s251_s1 = sshll.u32 %s432_s0, 4  ;;  %s252_s1 = int_to_ptr.vmem [resolvable:$true] %s251_s1 }
  0x14   :  { %149 = vmatpush.bf16.msra.mxu1 %v298_v11  ;;  %328 = vmatpush.bf16.msra.mxu3 %v298_v11 }
  0x15   :  { %v70_v28 = vpack.c.b16 %v67_v27, %v67_v27 }
  0x17   :  { %127 = vmatpush.bf16.msra.mxu0 %v286_v16  ;;  %325 = vmatpush.bf16.msra.mxu2 %v286_v16 }
  0x18   :  { %150 = vmatpush.bf16.msra.mxu1 %v290_v17  ;;  %329 = vmatpush.bf16.msra.mxu3 %v290_v17 }
  0x1b   :  { %128 = vmatpush.bf16.msra.mxu0 %v278_v22  ;;  %326 = vmatpush.bf16.msra.mxu2 %v278_v22 }
  0x1c   :  { %151 = vmatpush.bf16.msra.mxu1 %v282_v23  ;;  %330 = vmatpush.bf16.msra.mxu3 %v282_v23 }
  0x1e   :  { %307 = vmatmul.msk.bf16.vlgmr.msra.gmra.mxu0 %vm111_vm0, %v313_v24  ;;  %308 = vmatmul.msk.bf16.vlgmr.msra.gmra.mxu2 %vm111_vm0, %v314_v25 }
  0x1f   :  { %310 = vmatmul.msk.bf16.vlgmr.msra.gmra.mxu1 %vm111_vm0, %v313_v24  ;;  %311 = vmatmul.msk.bf16.vlgmr.msra.gmra.mxu3 %vm111_vm0, %v314_v25 }
  0x2e   :  { %309 = vmatmul.msk.bf16.gmra.mxu2 %vm111_vm0, %v70_v28 }
  0x2f   :  { %312 = vmatmul.msk.bf16.gmra.mxu3 %vm111_vm0, %v70_v28 }
  0x9b   :  { %v130_v29 = vpop.f32.mrf.mxu0 }
  0x9c   :  { %v167_v30 = vmul.f32 %v130_v29, %v130_v29  ;;  %v153_v31 = vpop.f32.mrf.mxu1 }
  0x9d   :  { %v172_v32 = vmul.f32 %v153_v31, %v153_v31 }
  0x9f   :  { %v177_v33 = vadd.f32 %v172_v32, %v167_v30 }
  0xa1   :  { %338 = vrsqrt.f32 %v177_v33  ;;  %v135_v34 = vpop.f32.mrf.mxu2  ;;  %vm189_vm1 = vcmp.eq.f32.partialorder %v177_v33, inf  ;;  %v192_v3 = vand.u32 2147483648, %v177_v33  ;;  %vm191_vm2 = vcmp.eq.f32.partialorder %v177_v33, 0.0 }
  0xa2   :  { %v169_v35 = vmul.f32 %v135_v34, %v135_v34  ;;  %v158_v36 = vpop.f32.mrf.mxu3 }
  0xa3   :  { %v174_v37 = vmul.f32 %v158_v36, %v158_v36  ;;  %v132_v38 = vpop.f32.mrf.mxu0 }
  0xa4   :  { %v168_v39 = vmul.f32 %v132_v38, %v132_v38  ;;  %v155_v40 = vpop.f32.mrf.mxu1 }
  0xa5   :  { %v179_v41 = vadd.f32 %v174_v37, %v169_v35  ;;  %v173_v42 = vmul.f32 %v155_v40, %v155_v40 }
  0xa7   :  { %v339_v43 = vpop.eup %338  ;;  %340 = vrsqrt.f32 %v179_v41  ;;  %v178_v44 = vadd.f32 %v173_v42, %v168_v39  ;;  %vm213_vm3 = vcmp.eq.f32.partialorder %v179_v41, inf  ;;  %v216_v17 = vand.u32 2147483648, %v179_v41 }
  0xa8   :  { %v183_v45 = vmul.f32 %v339_v43, %v177_v33  ;;  %vm215_vm4 = vcmp.eq.f32.partialorder %v179_v41, 0.0 }
  0xa9   :  { %342 = vrsqrt.f32 %v178_v44  ;;  %v137_v46 = vpop.f32.mrf.mxu2  ;;  %vm201_vm5 = vcmp.eq.f32.partialorder %v178_v44, inf  ;;  %v204_v22 = vand.u32 2147483648, %v178_v44  ;;  %vm203_vm6 = vcmp.eq.f32.partialorder %v178_v44, 0.0 }
  0xaa   :  { %v170_v47 = vmul.f32 %v137_v46, %v137_v46  ;;  %v160_v48 = vpop.f32.mrf.mxu3  ;;  %v184_v49 = vmul.f32 %v339_v43, %v183_v45 }
  0xab   :  { %v175_v50 = vmul.f32 %v160_v48, %v160_v48 }
  0xac   :  { %v185_v51 = vmul.f32 0.5, %v184_v49 }
  0xad   :  { %v341_v52 = vpop.eup %340  ;;  %v180_v53 = vadd.f32 %v175_v50, %v170_v47 }
  0xae   :  { %v207_v54 = vmul.f32 %v341_v52, %v179_v41  ;;  %v186_v55 = vsub.f32 1.5, %v185_v51 }
  0xaf   :  { %v343_v56 = vpop.eup %342  ;;  %344 = vrsqrt.f32 %v180_v53  ;;  %vm225_vm7 = vcmp.eq.f32.partialorder %v180_v53, inf  ;;  %v228_v32 = vand.u32 2147483648, %v180_v53  ;;  %vm227_vm8 = vcmp.eq.f32.partialorder %v180_v53, 0.0 }
  0xb0   :  { %v195_v57 = vmul.f32 %v343_v56, %v178_v44  ;;  %v187_v58 = vmul.f32 %v339_v43, %v186_v55  ;;  %v208_v59 = vmul.f32 %v341_v52, %v207_v54 }
  0xb1   :  { %v140_v60 = vpop.f32.mrf.mxu2 }
  0xb2   :  { %v171_v61 = vmul.f32 %v140_v60, %v140_v60  ;;  %v163_v62 = vpop.f32.mrf.mxu3  ;;  %v188_v63 = vmul.f32 %v187_v58, %v177_v33  ;;  %v196_v0 = vmul.f32 %v343_v56, %v195_v57  ;;  %v209_v1 = vmul.f32 0.5, %v208_v59 }
  0xb3   :  { %v176_v2 = vmul.f32 %v163_v62, %v163_v62 }
  0xb4   :  { %v190_v4 = vsel %vm189_vm1, %v177_v33, %v188_v63  ;;  %v197_v5 = vmul.f32 0.5, %v196_v0  ;;  %v210_v6 = vsub.f32 1.5, %v209_v1 }
  0xb5   :  { %v345_v7 = vpop.eup %344  ;;  %v181_v8 = vadd.f32 %v176_v2, %v171_v61  ;;  %v193_v9 = vsel %vm191_vm2, %v192_v3, %v190_v4 }
  0xb6   :  { %v219_v10 = vmul.f32 %v345_v7, %v180_v53  ;;  %v198_v11 = vsub.f32 1.5, %v197_v5  ;;  %v211_v12 = vmul.f32 %v341_v52, %v210_v6  ;;  %242 = vst [vmem:[#allocation7] sm:$0xff] %v193_v9 }
  0xb7   :  { %346 = vrsqrt.f32 %v181_v8  ;;  %vm237_vm9 = vcmp.eq.f32.partialorder %v181_v8, inf  ;;  %v240_v39 = vand.u32 2147483648, %v181_v8  ;;  %vm239_vm10 = vcmp.eq.f32.partialorder %v181_v8, 0.0 }
  0xb8   :  { %v199_v13 = vmul.f32 %v343_v56, %v198_v11  ;;  %v212_v14 = vmul.f32 %v211_v12, %v179_v41  ;;  %v220_v15 = vmul.f32 %v345_v7, %v219_v10 }
  0xb9   :  { %v142_v16 = vpop.f32.mrf.mxu2 }
  0xba   :  { %v165_v18 = vpop.f32.mrf.mxu3  ;;  %v200_v19 = vmul.f32 %v199_v13, %v178_v44  ;;  %v214_v20 = vsel %vm213_vm3, %v179_v41, %v212_v14  ;;  %v221_v21 = vmul.f32 0.5, %v220_v15 }
  0xbb   :  { %v217_v23 = vsel %vm215_vm4, %v216_v17, %v214_v20 }
  0xbc   :  { %v202_v24 = vsel %vm201_vm5, %v178_v44, %v200_v19  ;;  %v222_v25 = vsub.f32 1.5, %v221_v21  ;;  %244 = vst [vmem:[#allocation7 + $0x10] sm:$0xff] %v217_v23 }
  0xbd   :  { %v347_v26 = vpop.eup %346  ;;  %v205_v27 = vsel %vm203_vm6, %v204_v22, %v202_v24 }
  0xbe   :  { %v231_v28 = vmul.f32 %v347_v26, %v181_v8  ;;  %v223_v29 = vmul.f32 %v345_v7, %v222_v25  ;;  %243 = vst [vmem:[#allocation7 + $0x8] sm:$0xff] %v205_v27 }
  0xc0   :  { %v224_v30 = vmul.f32 %v223_v29, %v180_v53  ;;  %v232_v31 = vmul.f32 %v347_v26, %v231_v28 }
  0xc2   :  { %v226_v33 = vsel %vm225_vm7, %v180_v53, %v224_v30  ;;  %v233_v34 = vmul.f32 0.5, %v232_v31 }
  0xc3   :  { %v229_v35 = vsel %vm227_vm8, %v228_v32, %v226_v33 }
  0xc4   :  { %v234_v36 = vsub.f32 1.5, %v233_v34  ;;  %245 = vst [vmem:[#allocation7 + $0x18] sm:$0xff] %v229_v35 }
  0xc6   :  { %v235_v37 = vmul.f32 %v347_v26, %v234_v36 }
  0xc8   :  { %v236_v38 = vmul.f32 %v235_v37, %v181_v8 }
  0xca   :  { %v238_v40 = vsel %vm237_vm9, %v181_v8, %v236_v38 }
  0xcb   :  { %v241_v41 = vsel %vm239_vm10, %v240_v39, %v238_v40 }
  0xcc   :  { %246 = vst [vmem:[#allocation7 + $0x20] sm:$0xff] %v241_v41 }
  0xcd   :  { %259 = dma.vmem_to_hbm [thread:$0]  %s252_s1, 640, %s254_s25, [#allocation4], %s430_s21, %s430_s21, %s431_s22  }
  0xce   :  { %424 = dma.done.wait [#allocation4], 640  }
  0xcf   :  { %425 = vsyncadd [#allocation4], 4294966656 }
  0xd0   :  { %264 = vsyncpa [#allocation3], 1 }
  0xd1   :  { %265 = vsyncpa [#allocation6], 1 }
  0xd2   :  { %266 = vsyncpa [#allocation4], 1 }

</bundles_post_ra>
